<compile_context>
chip_gen: v7x
topology: tpu7x:2x2x1
jax: 0.10.0
libtpu: 0.0.40
codegen_flags: <defaults>
</compile_context>

<pallas_src>
import functools

import jax
import jax.numpy as jnp
import numpy as np
from jax import lax
from jax.experimental import pallas as pl
from jax.experimental.pallas import tpu as pltpu


# ----------------------------------------------------------------------------
# Fused decoder-block kernel: one grid step = one batch element.
#
#   x_ref    : (1, C1, h*w)         low-res input, channels-first, flat spatial
#   skip_ref : (1, C2, HW)          skip connection, flat spatial (HW = Hs*Ws)
#   up_ref   : (h*w, HW)            bilinear-2x-upsample + zero-pad matrix
#   mask_ref : (3, 1, HW)           column-validity masks for ox in {-1,0,+1}
#   w1_ref   : (9, Cout, C1+C2)     conv1 taps (BN scale folded in)
#   sh1_ref  : (Cout, 1)            conv1 folded shift (bias + BN)
#   w2_ref   : (9, Cout, Cout)      conv2 taps (BN scale folded in)
#   sh2_ref  : (Cout, 1)            conv2 folded shift
#   out_ref  : (1, Cout, HW)        lane-dense output (last dim mult. of 128)
#   buf1_ref : (C1+C2, HW + 2*pad)  VMEM staging buffer with zero halo
#   buf2_ref : (Cout,  HW + 2*pad)  VMEM staging buffer with zero halo
# ----------------------------------------------------------------------------
def _decoder_block_kernel(x_ref, skip_ref, up_ref, mask_ref,
                          w1_ref, sh1_ref, w2_ref, sh2_ref,
                          out_ref, buf1_ref, buf2_ref, *, out_w, pad):
    hw = out_ref.shape[2]
    c_up = x_ref.shape[1]

    # Bilinear 2x upsample (+ zero-pad placement) fused as one MXU matmul.
    up = jnp.dot(x_ref[0], up_ref[...], preferred_element_type=jnp.float32)

    # Channel concat [up ; skip] staged into a zero-haloed, lane-dense buffer.
    # The halo supplies the conv zero padding; the centre write is lane
    # aligned because `pad` is a multiple of 128.
    n1 = buf1_ref.shape[0]
    buf1_ref[:, :pad] = jnp.zeros((n1, pad), jnp.float32)
    buf1_ref[:, pad + hw:] = jnp.zeros((n1, pad), jnp.float32)
    buf1_ref[:c_up, pad:pad + hw] = up
    buf1_ref[c_up:, pad:pad + hw] = skip_ref[0]

    m_neg = mask_ref[0]          # (1, HW): valid output columns for ox = -1
    m_pos = mask_ref[2]          # (1, HW): valid output columns for ox = +1

    def conv3x3(src_ref, w_ref_):
        cout = w_ref_.shape[1]
        acc = jnp.zeros((cout, hw), jnp.float32)
        t = 0
        for oy in (-1, 0, 1):
            for ox in (-1, 0, 1):
                s = oy * out_w + ox
                # static lane-offset read of a full (C, HW) slab
                a = src_ref[:, pad + s:pad + s + hw]
                if ox == -1:
                    a = a * m_neg            # kill row-wrap contamination
                elif ox == 1:
                    a = a * m_pos
                acc = acc + jnp.dot(w_ref_[t], a,
                                    preferred_element_type=jnp.float32)
                t += 1
        return acc

    # conv1 (BN scale folded into w1) -> +shift -> ReLU
    y1 = jnp.maximum(conv3x3(buf1_ref, w1_ref) + sh1_ref[...], 0.0)

    n2 = buf2_ref.shape[0]
    buf2_ref[:, :pad] = jnp.zeros((n2, pad), jnp.float32)
    buf2_ref[:, pad + hw:] = jnp.zeros((n2, pad), jnp.float32)
    buf2_ref[:, pad:pad + hw] = y1

    # conv2 -> +shift -> ReLU
    y2 = jnp.maximum(conv3x3(buf2_ref, w2_ref) + sh2_ref[...], 0.0)

    out_ref[0] = y2


# ----------------------------------------------------------------------------
# Wrapper-side constant construction.
# ----------------------------------------------------------------------------
def _bilinear_up2_matrix_1d(n):
    """(n, 2n) matrix: align_corners=False bilinear 2x upsample, one axis."""
    u = np.zeros((n, 2 * n), dtype=np.float32)
    for y_out in range(2 * n):
        src = (y_out + 0.5) / 2.0 - 0.5
        i0 = int(np.floor(src))
        frac = src - i0
        for idx, wt in ((i0, 1.0 - frac), (i0 + 1, frac)):
            u[min(max(idx, 0), n - 1), y_out] += wt
    return u


def _upsample_pad_matrix(h, w, hs, ws):
    """(h*w, hs*ws) matrix: bilinear 2x upsample then zero-pad to (hs, ws)."""
    h2, w2 = 2 * h, 2 * w
    dy, dx = hs - h2, ws - w2
    # TODO(synk): negative diffs (cropping) are not supported by this matrix.
    uy = np.zeros((h, hs), dtype=np.float32)
    ux = np.zeros((w, ws), dtype=np.float32)
    uy[:, dy // 2:dy // 2 + h2] = _bilinear_up2_matrix_1d(h)
    ux[:, dx // 2:dx // 2 + w2] = _bilinear_up2_matrix_1d(w)
    u = np.einsum("iY,jX->ijYX", uy, ux).reshape(h * w, hs * ws)
    return jnp.asarray(u)


def _column_masks(hs, ws):
    """(3, 1, hs*ws) validity masks for x-shifts ox in {-1, 0, +1}."""
    col = np.arange(hs * ws, dtype=np.int64) % ws
    m = np.stack([((col + ox >= 0) & (col + ox < ws)).astype(np.float32)
                  for ox in (-1, 0, 1)])
    return jnp.asarray(m.reshape(3, 1, hs * ws))


def _fold_conv_bn(w_hwio, bias, gamma, beta, mean, var, eps):
    """Fold eval-mode BN (+conv bias) into per-tap weights and a shift."""
    scale = gamma / jnp.sqrt(var + eps)                      # (Cout,)
    shift = beta + (bias - mean) * scale                     # (Cout,)
    w_eff = w_hwio.astype(jnp.float32) * scale[None, None, None, :]
    kh, kw, cin, cout = w_eff.shape
    w_taps = jnp.transpose(w_eff.reshape(kh * kw, cin, cout), (0, 2, 1))
    return w_taps, shift.reshape(cout, 1).astype(jnp.float32)


# ----------------------------------------------------------------------------
# Decoder forward (bilinear_method=True, eval-mode BN, no dropout).
# Inputs/outputs in NCHW like the PyTorch module.
# ----------------------------------------------------------------------------
def decoder_forward(params, x_nchw, skip_nchw, *, eps=1e-5):
    n, c1, h, w = x_nchw.shape
    _, c2, hs, ws = skip_nchw.shape
    hw_in = h * w
    hw = hs * ws
    cout = params["w1"].shape[-1]
    pad = ((ws + 1 + 127) // 128) * 128          # lane-aligned halo >= ws + 1

    x_flat = x_nchw.reshape(n, c1, hw_in).astype(jnp.float32)
    skip_flat = skip_nchw.reshape(n, c2, hw).astype(jnp.float32)

    up_mat = _upsample_pad_matrix(h, w, hs, ws)
    masks = _column_masks(hs, ws)
    w1_taps, sh1 = _fold_conv_bn(params["w1"], params["b1"], params["g1"],
                                 params["be1"], params["m1"], params["v1"], eps)
    w2_taps, sh2 = _fold_conv_bn(params["w2"], params["b2"], params["g2"],
                                 params["be2"], params["m2"], params["v2"], eps)

    kernel = functools.partial(_decoder_block_kernel, out_w=ws, pad=pad)

    out_flat = pl.pallas_call(
        kernel,
        out_shape=jax.ShapeDtypeStruct((n, cout, hw), jnp.float32),
        grid=(n,),
        in_specs=[
            pl.BlockSpec((1, c1, hw_in), lambda i: (i, 0, 0)),
            pl.BlockSpec((1, c2, hw), lambda i: (i, 0, 0)),
            pl.BlockSpec((hw_in, hw), lambda i: (0, 0)),
            pl.BlockSpec((3, 1, hw), lambda i: (0, 0, 0)),
            pl.BlockSpec((9, cout, c1 + c2), lambda i: (0, 0, 0)),
            pl.BlockSpec((cout, 1), lambda i: (0, 0)),
            pl.BlockSpec((9, cout, cout), lambda i: (0, 0, 0)),
            pl.BlockSpec((cout, 1), lambda i: (0, 0)),
        ],
        out_specs=pl.BlockSpec((1, cout, hw), lambda i: (i, 0, 0)),
        scratch_shapes=[
            pltpu.VMEM((c1 + c2, hw + 2 * pad), jnp.float32),
            pltpu.VMEM((cout, hw + 2 * pad), jnp.float32),
        ],
        compiler_params=pltpu.CompilerParams(
            dimension_semantics=("parallel",)),   # v7x: batch across 2 cores
    )(x_flat, skip_flat, up_mat, masks, w1_taps, sh1, w2_taps, sh2)

    # (N, Cout, H*W) -> NCHW is a free reshape thanks to the lane-dense layout.
    return out_flat.reshape(n, cout, hs, ws)


# ----------------------------------------------------------------------------
# Deterministic parameter init (shapes as in Decoder(in_ch=8, out_ch=4)).
# Conv weights stored HWIO: (3, 3, Cin, Cout).
# ----------------------------------------------------------------------------
def init_params(key, in_ch, out_ch):
    ks = jax.random.split(key, 8)
    params = {
        "w1": 0.1 * jax.random.normal(ks[0], (3, 3, in_ch, out_ch), jnp.float32),
        "b1": 0.05 * jax.random.normal(ks[1], (out_ch,), jnp.float32),
        "g1": 1.0 + 0.1 * jax.random.normal(ks[2], (out_ch,), jnp.float32),
        "be1": 0.05 * jax.random.normal(ks[3], (out_ch,), jnp.float32),
        "m1": 0.02 * jax.random.normal(ks[4], (out_ch,), jnp.float32),
        "v1": 1.0 + 0.1 * jnp.abs(jax.random.normal(ks[5], (out_ch,), jnp.float32)),
        "w2": 0.1 * jax.random.normal(ks[6], (3, 3, out_ch, out_ch), jnp.float32),
        "b2": 0.05 * jax.random.normal(ks[7], (out_ch,), jnp.float32),
        "g2": 1.0 + 0.1 * jax.random.normal(ks[0], (out_ch,), jnp.float32),
        "be2": 0.05 * jax.random.normal(ks[1], (out_ch,), jnp.float32),
        "m2": 0.02 * jax.random.normal(ks[2], (out_ch,), jnp.float32),
        "v2": 1.0 + 0.1 * jnp.abs(jax.random.normal(ks[3], (out_ch,), jnp.float32)),
    }
    return params


# ----------------------------------------------------------------------------
# Pure-JAX reference (independent code path) for the sanity check.
# ----------------------------------------------------------------------------
def _upsample2x_ref(x):
    # torch nn.Upsample(scale_factor=2, mode='bilinear', align_corners=False)
    def along(a, axis):
        s = a.shape[axis]
        idx = jnp.arange(s)
        prv = jnp.take(a, jnp.clip(idx - 1, 0, s - 1), axis=axis)
        nxt = jnp.take(a, jnp.clip(idx + 1, 0, s - 1), axis=axis)
        even = 0.75 * a + 0.25 * prv
        odd = 0.75 * a + 0.25 * nxt
        stacked = jnp.stack([even, odd], axis=axis + 1)
        shp = list(a.shape)
        shp[axis] = 2 * s
        return stacked.reshape(shp)
    return along(along(x, 2), 3)


def _decoder_forward_ref(params, x_nchw, skip_nchw, eps=1e-5):
    x = _upsample2x_ref(x_nchw)
    dy = skip_nchw.shape[2] - x.shape[2]
    dx = skip_nchw.shape[3] - x.shape[3]
    if dy != 0 or dx != 0:
        x = jnp.pad(x, ((0, 0), (0, 0),
                        (dy // 2, dy - dy // 2),
                        (dx // 2, dx - dx // 2)))
    x = jnp.concatenate([x, skip_nchw], axis=1)

    def cbr(a, w, b, g, be, m, v):
        y = lax.conv_general_dilated(
            a, w, (1, 1), "SAME",
            dimension_numbers=("NCHW", "HWIO", "NCHW"),
            precision=lax.Precision.HIGHEST)
        y = y + b[None, :, None, None]
        y = ((y - m[None, :, None, None])
             / jnp.sqrt(v[None, :, None, None] + eps)
             * g[None, :, None, None] + be[None, :, None, None])
        return jnp.maximum(y, 0.0)

    p = params
    x = cbr(x, p["w1"], p["b1"], p["g1"], p["be1"], p["m1"], p["v1"])
    x = cbr(x, p["w2"], p["b2"], p["g2"], p["be2"], p["m2"], p["v2"])
    return x


if __name__ == "__main__":
    key = jax.random.PRNGKey(0)
    k_x, k_skip, k_p = jax.random.split(key, 3)

    # Decoder(in_ch=8, out_ch=4): x has 4 channels at half resolution,
    # skip has 4 channels at full resolution -> concat gives 8 channels.
    in_ch, out_ch = 8, 4
    x = jax.random.normal(k_x, (2, 4, 8, 8), jnp.float32)          # NCHW
    skip = jax.random.normal(k_skip, (2, 4, 16, 16), jnp.float32)  # NCHW

    params = init_params(k_p, in_ch, out_ch)

    out = jax.jit(decoder_forward)(params, x, skip)
    out = jax.block_until_ready(out)
    assert out.shape == (2, out_ch, 16, 16), out.shape

    # Sanity check the fused Pallas pipeline against a pure-JAX reference.
    ref = _decoder_forward_ref(params, x, skip)
    err = float(jnp.max(jnp.abs(out - ref)))
    assert err < 5e-3, err

    print("KERNEL_OK")
</pallas_src>

<mosaic_0001>
module attributes {stable_mosaic.version = 11 : i64} {
  func.func @_decoder_block_kernel(%arg0: i32, %arg1: memref<1x4x64xf32, #tpu.memory_space<vmem>>, %arg2: memref<1x4x256xf32, #tpu.memory_space<vmem>>, %arg3: memref<64x256xf32, #tpu.memory_space<vmem>>, %arg4: memref<3x1x256xf32, #tpu.memory_space<vmem>>, %arg5: memref<9x4x8xf32, #tpu.memory_space<vmem>>, %arg6: memref<4x1xf32, #tpu.memory_space<vmem>>, %arg7: memref<9x4x4xf32, #tpu.memory_space<vmem>>, %arg8: memref<4x1xf32, #tpu.memory_space<vmem>>, %arg9: memref<1x4x256xf32, #tpu.memory_space<vmem>>, %arg10: memref<8x512xf32, #tpu.memory_space<vmem>>, %arg11: memref<4x512xf32, #tpu.memory_space<vmem>>) attributes {dimension_semantics = [#tpu.dimension_semantics<parallel>], iteration_bounds = array<i64: 2>, scalar_prefetch = 0 : i64, scratch_operands = 2 : i64, tpu.core_type = #tpu.core_type<tc>, window_params = [{transform_indices = @transform_0, window_bounds = array<i64: 1, 4, 64>}, {transform_indices = @transform_1, window_bounds = array<i64: 1, 4, 256>}, {pipeline_mode = #tpu.pipeline_mode<synchronous>, transform_indices = @transform_2, window_bounds = array<i64: 64, 256>}, {pipeline_mode = #tpu.pipeline_mode<synchronous>, transform_indices = @transform_3, window_bounds = array<i64: 3, 1, 256>}, {pipeline_mode = #tpu.pipeline_mode<synchronous>, transform_indices = @transform_4, window_bounds = array<i64: 9, 4, 8>}, {pipeline_mode = #tpu.pipeline_mode<synchronous>, transform_indices = @transform_5, window_bounds = array<i64: 4, 1>}, {pipeline_mode = #tpu.pipeline_mode<synchronous>, transform_indices = @transform_6, window_bounds = array<i64: 9, 4, 4>}, {pipeline_mode = #tpu.pipeline_mode<synchronous>, transform_indices = @transform_7, window_bounds = array<i64: 4, 1>}, {transform_indices = @transform_8, window_bounds = array<i64: 1, 4, 256>}]} {
    %c0 = arith.constant 0 : index
    %c0_0 = arith.constant 0 : index
    %c0_1 = arith.constant 0 : index
    %0 = vector.load %arg1[%c0, %c0_0, %c0_1] : memref<1x4x64xf32, #tpu.memory_space<vmem>>, vector<1x4x64xf32>
    %1 = vector.shape_cast %0 : vector<1x4x64xf32> to vector<4x64xf32>
    %c0_2 = arith.constant 0 : index
    %c0_3 = arith.constant 0 : index
    %2 = vector.load %arg3[%c0_2, %c0_3] : memref<64x256xf32, #tpu.memory_space<vmem>>, vector<64x256xf32>
    %cst = arith.constant dense<0.000000e+00> : vector<4x256xf32>
    %3 = tpu.matmul %1, %2, %cst {dimension_numbers = #tpu.dot_dimension_numbers<[1], [0], [0], [1], [0, 0, 1, 1], [], []>} : vector<4x64xf32>, vector<64x256xf32>, vector<4x256xf32> -> vector<4x256xf32>
    %cst_4 = arith.constant 0.000000e+00 : f32
    %4 = vector.broadcast %cst_4 : f32 to vector<8x128xf32>
    %c0_5 = arith.constant 0 : index
    %c0_6 = arith.constant 0 : index
    %5 = vector.load %arg10[%c0_5, %c0_6] : memref<8x512xf32, #tpu.memory_space<vmem>>, vector<8x128xf32>
    tpu.vector_store %arg10[%c0_5, %c0_6], %4 {strides = array<i32>} : memref<8x512xf32, #tpu.memory_space<vmem>>, vector<8x128xf32>,
    %cst_7 = arith.constant 0.000000e+00 : f32
    %6 = vector.broadcast %cst_7 : f32 to vector<8x128xf32>
    %c0_8 = arith.constant 0 : index
    %c384 = arith.constant 384 : index
    %7 = vector.load %arg10[%c0_8, %c384] : memref<8x512xf32, #tpu.memory_space<vmem>>, vector<8x128xf32>
    tpu.vector_store %arg10[%c0_8, %c384], %6 {strides = array<i32>} : memref<8x512xf32, #tpu.memory_space<vmem>>, vector<8x128xf32>,
    %c0_9 = arith.constant 0 : index
    %c128 = arith.constant 128 : index
    %8 = vector.load %arg10[%c0_9, %c128] : memref<8x512xf32, #tpu.memory_space<vmem>>, vector<4x256xf32>
    tpu.vector_store %arg10[%c0_9, %c128], %3 {strides = array<i32>} : memref<8x512xf32, #tpu.memory_space<vmem>>, vector<4x256xf32>,
    %c0_10 = arith.constant 0 : index
    %c0_11 = arith.constant 0 : index
    %c0_12 = arith.constant 0 : index
    %9 = vector.load %arg2[%c0_10, %c0_11, %c0_12] : memref<1x4x256xf32, #tpu.memory_space<vmem>>, vector<1x4x256xf32>
    %10 = vector.shape_cast %9 : vector<1x4x256xf32> to vector<4x256xf32>
    %c4 = arith.constant 4 : index
    %c128_13 = arith.constant 128 : index
    %11 = vector.load %arg10[%c4, %c128_13] : memref<8x512xf32, #tpu.memory_space<vmem>>, vector<4x256xf32>
    tpu.vector_store %arg10[%c4, %c128_13], %10 {strides = array<i32>} : memref<8x512xf32, #tpu.memory_space<vmem>>, vector<4x256xf32>,
    %c0_14 = arith.constant 0 : index
    %c0_15 = arith.constant 0 : index
    %c0_16 = arith.constant 0 : index
    %12 = vector.load %arg4[%c0_14, %c0_15, %c0_16] : memref<3x1x256xf32, #tpu.memory_space<vmem>>, vector<1x1x256xf32>
    %13 = vector.shape_cast %12 : vector<1x1x256xf32> to vector<1x256xf32>
    %c2 = arith.constant 2 : index
    %c0_17 = arith.constant 0 : index
    %c0_18 = arith.constant 0 : index
    %14 = vector.load %arg4[%c2, %c0_17, %c0_18] : memref<3x1x256xf32, #tpu.memory_space<vmem>>, vector<1x1x256xf32>
    %15 = vector.shape_cast %14 : vector<1x1x256xf32> to vector<1x256xf32>
    %cst_19 = arith.constant 0.000000e+00 : f32
    %16 = vector.broadcast %cst_19 : f32 to vector<4x256xf32>
    %c0_20 = arith.constant 0 : index
    %c111 = arith.constant 111 : index
    %17 = vector.load %arg10[%c0_20, %c111] : memref<8x512xf32, #tpu.memory_space<vmem>>, vector<8x256xf32>
    %18 = vector.broadcast %13 : vector<1x256xf32> to vector<8x256xf32>
    %19 = arith.mulf %17, %18 : vector<8x256xf32>
    %c0_21 = arith.constant 0 : index
    %c0_22 = arith.constant 0 : index
    %c0_23 = arith.constant 0 : index
    %20 = vector.load %arg5[%c0_21, %c0_22, %c0_23] : memref<9x4x8xf32, #tpu.memory_space<vmem>>, vector<1x4x8xf32>
    %21 = vector.shape_cast %20 : vector<1x4x8xf32> to vector<4x8xf32>
    %cst_24 = arith.constant dense<0.000000e+00> : vector<4x256xf32>
    %22 = tpu.matmul %21, %19, %cst_24 {dimension_numbers = #tpu.dot_dimension_numbers<[1], [0], [0], [1], [0, 0, 1, 1], [], []>} : vector<4x8xf32>, vector<8x256xf32>, vector<4x256xf32> -> vector<4x256xf32>
    %23 = arith.addf %16, %22 : vector<4x256xf32>
    %c0_25 = arith.constant 0 : index
    %c112 = arith.constant 112 : index
    %24 = vector.load %arg10[%c0_25, %c112] : memref<8x512xf32, #tpu.memory_space<vmem>>, vector<8x256xf32>
    %c1 = arith.constant 1 : index
    %c0_26 = arith.constant 0 : index
    %c0_27 = arith.constant 0 : index
    %25 = vector.load %arg5[%c1, %c0_26, %c0_27] : memref<9x4x8xf32, #tpu.memory_space<vmem>>, vector<1x4x8xf32>
    %26 = vector.shape_cast %25 : vector<1x4x8xf32> to vector<4x8xf32>
    %cst_28 = arith.constant dense<0.000000e+00> : vector<4x256xf32>
    %27 = tpu.matmul %26, %24, %cst_28 {dimension_numbers = #tpu.dot_dimension_numbers<[1], [0], [0], [1], [0, 0, 1, 1], [], []>} : vector<4x8xf32>, vector<8x256xf32>, vector<4x256xf32> -> vector<4x256xf32>
    %28 = arith.addf %23, %27 : vector<4x256xf32>
    %c0_29 = arith.constant 0 : index
    %c113 = arith.constant 113 : index
    %29 = vector.load %arg10[%c0_29, %c113] : memref<8x512xf32, #tpu.memory_space<vmem>>, vector<8x256xf32>
    %30 = vector.broadcast %15 : vector<1x256xf32> to vector<8x256xf32>
    %31 = arith.mulf %29, %30 : vector<8x256xf32>
    %c2_30 = arith.constant 2 : index
    %c0_31 = arith.constant 0 : index
    %c0_32 = arith.constant 0 : index
    %32 = vector.load %arg5[%c2_30, %c0_31, %c0_32] : memref<9x4x8xf32, #tpu.memory_space<vmem>>, vector<1x4x8xf32>
    %33 = vector.shape_cast %32 : vector<1x4x8xf32> to vector<4x8xf32>
    %cst_33 = arith.constant dense<0.000000e+00> : vector<4x256xf32>
    %34 = tpu.matmul %33, %31, %cst_33 {dimension_numbers = #tpu.dot_dimension_numbers<[1], [0], [0], [1], [0, 0, 1, 1], [], []>} : vector<4x8xf32>, vector<8x256xf32>, vector<4x256xf32> -> vector<4x256xf32>
    %35 = arith.addf %28, %34 : vector<4x256xf32>
    %c0_34 = arith.constant 0 : index
    %c127 = arith.constant 127 : index
    %36 = vector.load %arg10[%c0_34, %c127] : memref<8x512xf32, #tpu.memory_space<vmem>>, vector<8x256xf32>
    %37 = vector.broadcast %13 : vector<1x256xf32> to vector<8x256xf32>
    %38 = arith.mulf %36, %37 : vector<8x256xf32>
    %c3 = arith.constant 3 : index
    %c0_35 = arith.constant 0 : index
    %c0_36 = arith.constant 0 : index
    %39 = vector.load %arg5[%c3, %c0_35, %c0_36] : memref<9x4x8xf32, #tpu.memory_space<vmem>>, vector<1x4x8xf32>
    %40 = vector.shape_cast %39 : vector<1x4x8xf32> to vector<4x8xf32>
    %cst_37 = arith.constant dense<0.000000e+00> : vector<4x256xf32>
    %41 = tpu.matmul %40, %38, %cst_37 {dimension_numbers = #tpu.dot_dimension_numbers<[1], [0], [0], [1], [0, 0, 1, 1], [], []>} : vector<4x8xf32>, vector<8x256xf32>, vector<4x256xf32> -> vector<4x256xf32>
    %42 = arith.addf %35, %41 : vector<4x256xf32>
    %c0_38 = arith.constant 0 : index
    %c128_39 = arith.constant 128 : index
    %43 = vector.load %arg10[%c0_38, %c128_39] : memref<8x512xf32, #tpu.memory_space<vmem>>, vector<8x256xf32>
    %c4_40 = arith.constant 4 : index
    %c0_41 = arith.constant 0 : index
    %c0_42 = arith.constant 0 : index
    %44 = vector.load %arg5[%c4_40, %c0_41, %c0_42] : memref<9x4x8xf32, #tpu.memory_space<vmem>>, vector<1x4x8xf32>
    %45 = vector.shape_cast %44 : vector<1x4x8xf32> to vector<4x8xf32>
    %cst_43 = arith.constant dense<0.000000e+00> : vector<4x256xf32>
    %46 = tpu.matmul %45, %43, %cst_43 {dimension_numbers = #tpu.dot_dimension_numbers<[1], [0], [0], [1], [0, 0, 1, 1], [], []>} : vector<4x8xf32>, vector<8x256xf32>, vector<4x256xf32> -> vector<4x256xf32>
    %47 = arith.addf %42, %46 : vector<4x256xf32>
    %c0_44 = arith.constant 0 : index
    %c129 = arith.constant 129 : index
    %48 = vector.load %arg10[%c0_44, %c129] : memref<8x512xf32, #tpu.memory_space<vmem>>, vector<8x256xf32>
    %49 = vector.broadcast %15 : vector<1x256xf32> to vector<8x256xf32>
    %50 = arith.mulf %48, %49 : vector<8x256xf32>
    %c5 = arith.constant 5 : index
    %c0_45 = arith.constant 0 : index
    %c0_46 = arith.constant 0 : index
    %51 = vector.load %arg5[%c5, %c0_45, %c0_46] : memref<9x4x8xf32, #tpu.memory_space<vmem>>, vector<1x4x8xf32>
    %52 = vector.shape_cast %51 : vector<1x4x8xf32> to vector<4x8xf32>
    %cst_47 = arith.constant dense<0.000000e+00> : vector<4x256xf32>
    %53 = tpu.matmul %52, %50, %cst_47 {dimension_numbers = #tpu.dot_dimension_numbers<[1], [0], [0], [1], [0, 0, 1, 1], [], []>} : vector<4x8xf32>, vector<8x256xf32>, vector<4x256xf32> -> vector<4x256xf32>
    %54 = arith.addf %47, %53 : vector<4x256xf32>
    %c0_48 = arith.constant 0 : index
    %c143 = arith.constant 143 : index
    %55 = vector.load %arg10[%c0_48, %c143] : memref<8x512xf32, #tpu.memory_space<vmem>>, vector<8x256xf32>
    %56 = vector.broadcast %13 : vector<1x256xf32> to vector<8x256xf32>
    %57 = arith.mulf %55, %56 : vector<8x256xf32>
    %c6 = arith.constant 6 : index
    %c0_49 = arith.constant 0 : index
    %c0_50 = arith.constant 0 : index
    %58 = vector.load %arg5[%c6, %c0_49, %c0_50] : memref<9x4x8xf32, #tpu.memory_space<vmem>>, vector<1x4x8xf32>
    %59 = vector.shape_cast %58 : vector<1x4x8xf32> to vector<4x8xf32>
    %cst_51 = arith.constant dense<0.000000e+00> : vector<4x256xf32>
    %60 = tpu.matmul %59, %57, %cst_51 {dimension_numbers = #tpu.dot_dimension_numbers<[1], [0], [0], [1], [0, 0, 1, 1], [], []>} : vector<4x8xf32>, vector<8x256xf32>, vector<4x256xf32> -> vector<4x256xf32>
    %61 = arith.addf %54, %60 : vector<4x256xf32>
    %c0_52 = arith.constant 0 : index
    %c144 = arith.constant 144 : index
    %62 = vector.load %arg10[%c0_52, %c144] : memref<8x512xf32, #tpu.memory_space<vmem>>, vector<8x256xf32>
    %c7 = arith.constant 7 : index
    %c0_53 = arith.constant 0 : index
    %c0_54 = arith.constant 0 : index
    %63 = vector.load %arg5[%c7, %c0_53, %c0_54] : memref<9x4x8xf32, #tpu.memory_space<vmem>>, vector<1x4x8xf32>
    %64 = vector.shape_cast %63 : vector<1x4x8xf32> to vector<4x8xf32>
    %cst_55 = arith.constant dense<0.000000e+00> : vector<4x256xf32>
    %65 = tpu.matmul %64, %62, %cst_55 {dimension_numbers = #tpu.dot_dimension_numbers<[1], [0], [0], [1], [0, 0, 1, 1], [], []>} : vector<4x8xf32>, vector<8x256xf32>, vector<4x256xf32> -> vector<4x256xf32>
    %66 = arith.addf %61, %65 : vector<4x256xf32>
    %c0_56 = arith.constant 0 : index
    %c145 = arith.constant 145 : index
    %67 = vector.load %arg10[%c0_56, %c145] : memref<8x512xf32, #tpu.memory_space<vmem>>, vector<8x256xf32>
    %68 = vector.broadcast %15 : vector<1x256xf32> to vector<8x256xf32>
    %69 = arith.mulf %67, %68 : vector<8x256xf32>
    %c8 = arith.constant 8 : index
    %c0_57 = arith.constant 0 : index
    %c0_58 = arith.constant 0 : index
    %70 = vector.load %arg5[%c8, %c0_57, %c0_58] : memref<9x4x8xf32, #tpu.memory_space<vmem>>, vector<1x4x8xf32>
    %71 = vector.shape_cast %70 : vector<1x4x8xf32> to vector<4x8xf32>
    %cst_59 = arith.constant dense<0.000000e+00> : vector<4x256xf32>
    %72 = tpu.matmul %71, %69, %cst_59 {dimension_numbers = #tpu.dot_dimension_numbers<[1], [0], [0], [1], [0, 0, 1, 1], [], []>} : vector<4x8xf32>, vector<8x256xf32>, vector<4x256xf32> -> vector<4x256xf32>
    %73 = arith.addf %66, %72 : vector<4x256xf32>
    %c0_60 = arith.constant 0 : index
    %c0_61 = arith.constant 0 : index
    %74 = vector.load %arg6[%c0_60, %c0_61] : memref<4x1xf32, #tpu.memory_space<vmem>>, vector<4x1xf32>
    %75 = vector.broadcast %74 : vector<4x1xf32> to vector<4x256xf32>
    %76 = arith.addf %73, %75 : vector<4x256xf32>
    %cst_62 = arith.constant 0.000000e+00 : f32
    %77 = vector.broadcast %cst_62 : f32 to vector<4x256xf32>
    %78 = arith.maximumf %76, %77 : vector<4x256xf32>
    %cst_63 = arith.constant 0.000000e+00 : f32
    %79 = vector.broadcast %cst_63 : f32 to vector<4x128xf32>
    %c0_64 = arith.constant 0 : index
    %c0_65 = arith.constant 0 : index
    %80 = vector.load %arg11[%c0_64, %c0_65] : memref<4x512xf32, #tpu.memory_space<vmem>>, vector<4x128xf32>
    tpu.vector_store %arg11[%c0_64, %c0_65], %79 {strides = array<i32>} : memref<4x512xf32, #tpu.memory_space<vmem>>, vector<4x128xf32>,
    %cst_66 = arith.constant 0.000000e+00 : f32
    %81 = vector.broadcast %cst_66 : f32 to vector<4x128xf32>
    %c0_67 = arith.constant 0 : index
    %c384_68 = arith.constant 384 : index
    %82 = vector.load %arg11[%c0_67, %c384_68] : memref<4x512xf32, #tpu.memory_space<vmem>>, vector<4x128xf32>
    tpu.vector_store %arg11[%c0_67, %c384_68], %81 {strides = array<i32>} : memref<4x512xf32, #tpu.memory_space<vmem>>, vector<4x128xf32>,
    %c0_69 = arith.constant 0 : index
    %c128_70 = arith.constant 128 : index
    %83 = vector.load %arg11[%c0_69, %c128_70] : memref<4x512xf32, #tpu.memory_space<vmem>>, vector<4x256xf32>
    tpu.vector_store %arg11[%c0_69, %c128_70], %78 {strides = array<i32>} : memref<4x512xf32, #tpu.memory_space<vmem>>, vector<4x256xf32>,
    %cst_71 = arith.constant 0.000000e+00 : f32
    %84 = vector.broadcast %cst_71 : f32 to vector<4x256xf32>
    %c0_72 = arith.constant 0 : index
    %c111_73 = arith.constant 111 : index
    %85 = vector.load %arg11[%c0_72, %c111_73] : memref<4x512xf32, #tpu.memory_space<vmem>>, vector<4x256xf32>
    %86 = vector.broadcast %13 : vector<1x256xf32> to vector<4x256xf32>
    %87 = arith.mulf %85, %86 : vector<4x256xf32>
    %c0_74 = arith.constant 0 : index
    %c0_75 = arith.constant 0 : index
    %c0_76 = arith.constant 0 : index
    %88 = vector.load %arg7[%c0_74, %c0_75, %c0_76] : memref<9x4x4xf32, #tpu.memory_space<vmem>>, vector<1x4x4xf32>
    %89 = vector.shape_cast %88 : vector<1x4x4xf32> to vector<4x4xf32>
    %cst_77 = arith.constant dense<0.000000e+00> : vector<4x256xf32>
    %90 = tpu.matmul %89, %87, %cst_77 {dimension_numbers = #tpu.dot_dimension_numbers<[1], [0], [0], [1], [0, 0, 1, 1], [], []>} : vector<4x4xf32>, vector<4x256xf32>, vector<4x256xf32> -> vector<4x256xf32>
    %91 = arith.addf %84, %90 : vector<4x256xf32>
    %c0_78 = arith.constant 0 : index
    %c112_79 = arith.constant 112 : index
    %92 = vector.load %arg11[%c0_78, %c112_79] : memref<4x512xf32, #tpu.memory_space<vmem>>, vector<4x256xf32>
    %c1_80 = arith.constant 1 : index
    %c0_81 = arith.constant 0 : index
    %c0_82 = arith.constant 0 : index
    %93 = vector.load %arg7[%c1_80, %c0_81, %c0_82] : memref<9x4x4xf32, #tpu.memory_space<vmem>>, vector<1x4x4xf32>
    %94 = vector.shape_cast %93 : vector<1x4x4xf32> to vector<4x4xf32>
    %cst_83 = arith.constant dense<0.000000e+00> : vector<4x256xf32>
    %95 = tpu.matmul %94, %92, %cst_83 {dimension_numbers = #tpu.dot_dimension_numbers<[1], [0], [0], [1], [0, 0, 1, 1], [], []>} : vector<4x4xf32>, vector<4x256xf32>, vector<4x256xf32> -> vector<4x256xf32>
    %96 = arith.addf %91, %95 : vector<4x256xf32>
    %c0_84 = arith.constant 0 : index
    %c113_85 = arith.constant 113 : index
    %97 = vector.load %arg11[%c0_84, %c113_85] : memref<4x512xf32, #tpu.memory_space<vmem>>, vector<4x256xf32>
    %98 = vector.broadcast %15 : vector<1x256xf32> to vector<4x256xf32>
    %99 = arith.mulf %97, %98 : vector<4x256xf32>
    %c2_86 = arith.constant 2 : index
    %c0_87 = arith.constant 0 : index
    %c0_88 = arith.constant 0 : index
    %100 = vector.load %arg7[%c2_86, %c0_87, %c0_88] : memref<9x4x4xf32, #tpu.memory_space<vmem>>, vector<1x4x4xf32>
    %101 = vector.shape_cast %100 : vector<1x4x4xf32> to vector<4x4xf32>
    %cst_89 = arith.constant dense<0.000000e+00> : vector<4x256xf32>
    %102 = tpu.matmul %101, %99, %cst_89 {dimension_numbers = #tpu.dot_dimension_numbers<[1], [0], [0], [1], [0, 0, 1, 1], [], []>} : vector<4x4xf32>, vector<4x256xf32>, vector<4x256xf32> -> vector<4x256xf32>
    %103 = arith.addf %96, %102 : vector<4x256xf32>
    %c0_90 = arith.constant 0 : index
    %c127_91 = arith.constant 127 : index
    %104 = vector.load %arg11[%c0_90, %c127_91] : memref<4x512xf32, #tpu.memory_space<vmem>>, vector<4x256xf32>
    %105 = vector.broadcast %13 : vector<1x256xf32> to vector<4x256xf32>
    %106 = arith.mulf %104, %105 : vector<4x256xf32>
    %c3_92 = arith.constant 3 : index
    %c0_93 = arith.constant 0 : index
    %c0_94 = arith.constant 0 : index
    %107 = vector.load %arg7[%c3_92, %c0_93, %c0_94] : memref<9x4x4xf32, #tpu.memory_space<vmem>>, vector<1x4x4xf32>
    %108 = vector.shape_cast %107 : vector<1x4x4xf32> to vector<4x4xf32>
    %cst_95 = arith.constant dense<0.000000e+00> : vector<4x256xf32>
    %109 = tpu.matmul %108, %106, %cst_95 {dimension_numbers = #tpu.dot_dimension_numbers<[1], [0], [0], [1], [0, 0, 1, 1], [], []>} : vector<4x4xf32>, vector<4x256xf32>, vector<4x256xf32> -> vector<4x256xf32>
    %110 = arith.addf %103, %109 : vector<4x256xf32>
    %c0_96 = arith.constant 0 : index
    %c128_97 = arith.constant 128 : index
    %111 = vector.load %arg11[%c0_96, %c128_97] : memref<4x512xf32, #tpu.memory_space<vmem>>, vector<4x256xf32>
    %c4_98 = arith.constant 4 : index
    %c0_99 = arith.constant 0 : index
    %c0_100 = arith.constant 0 : index
    %112 = vector.load %arg7[%c4_98, %c0_99, %c0_100] : memref<9x4x4xf32, #tpu.memory_space<vmem>>, vector<1x4x4xf32>
    %113 = vector.shape_cast %112 : vector<1x4x4xf32> to vector<4x4xf32>
    %cst_101 = arith.constant dense<0.000000e+00> : vector<4x256xf32>
    %114 = tpu.matmul %113, %111, %cst_101 {dimension_numbers = #tpu.dot_dimension_numbers<[1], [0], [0], [1], [0, 0, 1, 1], [], []>} : vector<4x4xf32>, vector<4x256xf32>, vector<4x256xf32> -> vector<4x256xf32>
    %115 = arith.addf %110, %114 : vector<4x256xf32>
    %c0_102 = arith.constant 0 : index
    %c129_103 = arith.constant 129 : index
    %116 = vector.load %arg11[%c0_102, %c129_103] : memref<4x512xf32, #tpu.memory_space<vmem>>, vector<4x256xf32>
    %117 = vector.broadcast %15 : vector<1x256xf32> to vector<4x256xf32>
    %118 = arith.mulf %116, %117 : vector<4x256xf32>
    %c5_104 = arith.constant 5 : index
    %c0_105 = arith.constant 0 : index
    %c0_106 = arith.constant 0 : index
    %119 = vector.load %arg7[%c5_104, %c0_105, %c0_106] : memref<9x4x4xf32, #tpu.memory_space<vmem>>, vector<1x4x4xf32>
    %120 = vector.shape_cast %119 : vector<1x4x4xf32> to vector<4x4xf32>
    %cst_107 = arith.constant dense<0.000000e+00> : vector<4x256xf32>
    %121 = tpu.matmul %120, %118, %cst_107 {dimension_numbers = #tpu.dot_dimension_numbers<[1], [0], [0], [1], [0, 0, 1, 1], [], []>} : vector<4x4xf32>, vector<4x256xf32>, vector<4x256xf32> -> vector<4x256xf32>
    %122 = arith.addf %115, %121 : vector<4x256xf32>
    %c0_108 = arith.constant 0 : index
    %c143_109 = arith.constant 143 : index
    %123 = vector.load %arg11[%c0_108, %c143_109] : memref<4x512xf32, #tpu.memory_space<vmem>>, vector<4x256xf32>
    %124 = vector.broadcast %13 : vector<1x256xf32> to vector<4x256xf32>
    %125 = arith.mulf %123, %124 : vector<4x256xf32>
    %c6_110 = arith.constant 6 : index
    %c0_111 = arith.constant 0 : index
    %c0_112 = arith.constant 0 : index
    %126 = vector.load %arg7[%c6_110, %c0_111, %c0_112] : memref<9x4x4xf32, #tpu.memory_space<vmem>>, vector<1x4x4xf32>
    %127 = vector.shape_cast %126 : vector<1x4x4xf32> to vector<4x4xf32>
    %cst_113 = arith.constant dense<0.000000e+00> : vector<4x256xf32>
    %128 = tpu.matmul %127, %125, %cst_113 {dimension_numbers = #tpu.dot_dimension_numbers<[1], [0], [0], [1], [0, 0, 1, 1], [], []>} : vector<4x4xf32>, vector<4x256xf32>, vector<4x256xf32> -> vector<4x256xf32>
    %129 = arith.addf %122, %128 : vector<4x256xf32>
    %c0_114 = arith.constant 0 : index
    %c144_115 = arith.constant 144 : index
    %130 = vector.load %arg11[%c0_114, %c144_115] : memref<4x512xf32, #tpu.memory_space<vmem>>, vector<4x256xf32>
    %c7_116 = arith.constant 7 : index
    %c0_117 = arith.constant 0 : index
    %c0_118 = arith.constant 0 : index
    %131 = vector.load %arg7[%c7_116, %c0_117, %c0_118] : memref<9x4x4xf32, #tpu.memory_space<vmem>>, vector<1x4x4xf32>
    %132 = vector.shape_cast %131 : vector<1x4x4xf32> to vector<4x4xf32>
    %cst_119 = arith.constant dense<0.000000e+00> : vector<4x256xf32>
    %133 = tpu.matmul %132, %130, %cst_119 {dimension_numbers = #tpu.dot_dimension_numbers<[1], [0], [0], [1], [0, 0, 1, 1], [], []>} : vector<4x4xf32>, vector<4x256xf32>, vector<4x256xf32> -> vector<4x256xf32>
    %134 = arith.addf %129, %133 : vector<4x256xf32>
    %c0_120 = arith.constant 0 : index
    %c145_121 = arith.constant 145 : index
    %135 = vector.load %arg11[%c0_120, %c145_121] : memref<4x512xf32, #tpu.memory_space<vmem>>, vector<4x256xf32>
    %136 = vector.broadcast %15 : vector<1x256xf32> to vector<4x256xf32>
    %137 = arith.mulf %135, %136 : vector<4x256xf32>
    %c8_122 = arith.constant 8 : index
    %c0_123 = arith.constant 0 : index
    %c0_124 = arith.constant 0 : index
    %138 = vector.load %arg7[%c8_122, %c0_123, %c0_124] : memref<9x4x4xf32, #tpu.memory_space<vmem>>, vector<1x4x4xf32>
    %139 = vector.shape_cast %138 : vector<1x4x4xf32> to vector<4x4xf32>
    %cst_125 = arith.constant dense<0.000000e+00> : vector<4x256xf32>
    %140 = tpu.matmul %139, %137, %cst_125 {dimension_numbers = #tpu.dot_dimension_numbers<[1], [0], [0], [1], [0, 0, 1, 1], [], []>} : vector<4x4xf32>, vector<4x256xf32>, vector<4x256xf32> -> vector<4x256xf32>
    %141 = arith.addf %134, %140 : vector<4x256xf32>
    %c0_126 = arith.constant 0 : index
    %c0_127 = arith.constant 0 : index
    %142 = vector.load %arg8[%c0_126, %c0_127] : memref<4x1xf32, #tpu.memory_space<vmem>>, vector<4x1xf32>
    %143 = vector.broadcast %142 : vector<4x1xf32> to vector<4x256xf32>
    %144 = arith.addf %141, %143 : vector<4x256xf32>
    %cst_128 = arith.constant 0.000000e+00 : f32
    %145 = vector.broadcast %cst_128 : f32 to vector<4x256xf32>
    %146 = arith.maximumf %144, %145 : vector<4x256xf32>
    %c0_129 = arith.constant 0 : index
    %c0_130 = arith.constant 0 : index
    %c0_131 = arith.constant 0 : index
    %147 = vector.load %arg9[%c0_129, %c0_130, %c0_131] : memref<1x4x256xf32, #tpu.memory_space<vmem>>, vector<1x4x256xf32>
    %148 = vector.shape_cast %147 : vector<1x4x256xf32> to vector<4x256xf32>
    %149 = vector.shape_cast %146 : vector<4x256xf32> to vector<1x4x256xf32>
    tpu.vector_store %arg9[%c0_129, %c0_130, %c0_131], %149 {strides = array<i32>} : memref<1x4x256xf32, #tpu.memory_space<vmem>>, vector<1x4x256xf32>,
    return
  }
  func.func @transform_0(%arg0: i32) -> (i32, i32, i32) {
    %c0_i32 = arith.constant 0 : i32
    %c0_i32_0 = arith.constant 0 : i32
    %c0_i32_1 = arith.constant 0 : i32
    return %arg0, %c0_i32, %c0_i32_0 : i32, i32, i32
  }
  func.func @transform_1(%arg0: i32) -> (i32, i32, i32) {
    %c0_i32 = arith.constant 0 : i32
    %c0_i32_0 = arith.constant 0 : i32
    %c0_i32_1 = arith.constant 0 : i32
    return %arg0, %c0_i32, %c0_i32_0 : i32, i32, i32
  }
  func.func @transform_2(%arg0: i32) -> (i32, i32) {
    %c0_i32 = arith.constant 0 : i32
    %c0_i32_0 = arith.constant 0 : i32
    %c0_i32_1 = arith.constant 0 : i32
    return %c0_i32, %c0_i32_0 : i32, i32
  }
  func.func @transform_3(%arg0: i32) -> (i32, i32, i32) {
    %c0_i32 = arith.constant 0 : i32
    %c0_i32_0 = arith.constant 0 : i32
    %c0_i32_1 = arith.constant 0 : i32
    %c0_i32_2 = arith.constant 0 : i32
    return %c0_i32, %c0_i32_0, %c0_i32_1 : i32, i32, i32
  }
  func.func @transform_4(%arg0: i32) -> (i32, i32, i32) {
    %c0_i32 = arith.constant 0 : i32
    %c0_i32_0 = arith.constant 0 : i32
    %c0_i32_1 = arith.constant 0 : i32
    %c0_i32_2 = arith.constant 0 : i32
    return %c0_i32, %c0_i32_0, %c0_i32_1 : i32, i32, i32
  }
  func.func @transform_5(%arg0: i32) -> (i32, i32) {
    %c0_i32 = arith.constant 0 : i32
    %c0_i32_0 = arith.constant 0 : i32
    %c0_i32_1 = arith.constant 0 : i32
    return %c0_i32, %c0_i32_0 : i32, i32
  }
  func.func @transform_6(%arg0: i32) -> (i32, i32, i32) {
    %c0_i32 = arith.constant 0 : i32
    %c0_i32_0 = arith.constant 0 : i32
    %c0_i32_1 = arith.constant 0 : i32
    %c0_i32_2 = arith.constant 0 : i32
    return %c0_i32, %c0_i32_0, %c0_i32_1 : i32, i32, i32
  }
  func.func @transform_7(%arg0: i32) -> (i32, i32) {
    %c0_i32 = arith.constant 0 : i32
    %c0_i32_0 = arith.constant 0 : i32
    %c0_i32_1 = arith.constant 0 : i32
    return %c0_i32, %c0_i32_0 : i32, i32
  }
  func.func @transform_8(%arg0: i32) -> (i32, i32, i32) {
    %c0_i32 = arith.constant 0 : i32
    %c0_i32_0 = arith.constant 0 : i32
    %c0_i32_1 = arith.constant 0 : i32
    return %arg0, %c0_i32, %c0_i32_0 : i32, i32, i32
  }
}

</mosaic_0001>

<bundles_post_ra>
// kernel: decoder_forward.1
= control target key start
LH: loop header
LB: loop body
LE: loop exit
PB: predicated region body
PF: predicated region fallthrough
CT: control target
= control target key end

     0   :  { %s2518_s27 = smov 0   ;;  %s2889_s0 = inlined_call_operand.vmem [shape: f32[2,4,64], index: 0, kind: input, shape index: {}]   ;;  %s2890_s1 = inlined_call_operand.vmem [shape: f32[2,4,256], index: 1, kind: input, shape index: {}]   ;;  %s2891_s2 = inlined_call_operand.vmem [shape: f32[64,256], index: 2, kind: input, shape index: {}]   ;;  %s2892_s3 = inlined_call_operand.vmem [shape: f32[3,1,256], index: 3, kind: input, shape index: {}]   ;;  %s2893_s4 = inlined_call_operand.vmem [shape: f32[9,4,8], index: 4, kind: input, shape index: {}]   ;;  %s2894_s5 = inlined_call_operand.vmem [shape: f32[4,1], index: 5, kind: input, shape index: {}]   ;;  %s2895_s6 = inlined_call_operand.vmem [shape: f32[9,4,4], index: 6, kind: input, shape index: {}]   ;;  %s2896_s7 = inlined_call_operand.vmem [shape: f32[4,1], index: 7, kind: input, shape index: {}]   ;;  %s2897_s8 = inlined_call_operand.vmem [shape: f32[2,4,256], index: 8, kind: output, shape index: {}]  }
   0x1 LB: > { %s2317_s28 = sadd.s32 4294967295, %s2461_s27   ;;  %p2321_p0 = scmp.ge.s32.totalorder %s2461_s27, 1  ;;  %s2461_s27 = sphi %s2518_s27, %s18_s27  }
   0x2   : > { %p271_p1 = scmp.lt.s32.totalorder %s2461_s27, 3 }
   0x4   : > { %p272_p2 = pnand %p2321_p0, %p271_p1 }
   0x5   : > { %v325_v0 = vld [vmem:[%s2891_s2 + $0x8] sm:$0xff] (!%p272_p2)  ;;  %v327_v1 = vld [vmem:[%s2891_s2 + $0x18] sm:$0xff] (!%p272_p2)  ;;  %v324_v2 = vld [vmem:[%s2891_s2] sm:$0xff] (!%p272_p2)  ;;  %p2535_p3 = scmp.lt.s32.totalorder (!%p272_p2), %s2317_s28, 1  ;;  %v432_v3 = vlaneseq (!%p272_p2)  ;;  %v2463_v8 = vmov (!%p272_p2), 0.0   ;;  %s2464_s24 = smov (!%p272_p2), 113  }
   0x6   : > { %275 = sbr.rel (%p272_p2) target bundleno = 1110 (0x456), region = 52  ;;  %v2385_v4 = vpack.c.bf16 (!%p272_p2), %v327_v1, %v325_v0  ;;  %v326_v5 = vld [vmem:[%s2891_s2 + $0x10] sm:$0xff] (!%p272_p2)  ;;  %v329_v6 = vld [vmem:[%s2891_s2 + $0x28] sm:$0xff] (!%p272_p2)  ;;  %v331_v7 = vld [vmem:[%s2891_s2 + $0x38] sm:$0xff] (!%p272_p2)  ;;  %408 = vmatprep.mubr.f32.mxu0 (!%p272_p2), %v2463_v8  ;;  %1338 = vst [vmem:[#allocation3] sm:$0xf] (!%p272_p2), %v2463_v8  ;;  %537 = vmatprep.mubr.f32.mxu1 (!%p272_p2), %v2463_v8 }
   0x7   : > { %1339 = vst [vmem:[#allocation3 + $0xc] sm:$0xf] (!%p272_p2), %v2463_v8  ;;  %v2387_v9 = vpack.c.bf16 (!%p272_p2), %v326_v5, %v324_v2  ;;  %v2389_v10 = vpack.c.bf16 (!%p272_p2), %v331_v7, %v329_v6  ;;  %v328_v11 = vld [vmem:[%s2891_s2 + $0x20] sm:$0xff] (!%p272_p2)  ;;  %v330_v12 = vld [vmem:[%s2891_s2 + $0x30] sm:$0xff] (!%p272_p2)  ;;  %v333_v13 = vld [vmem:[%s2891_s2 + $0x48] sm:$0xff] (!%p272_p2)  ;;  %v433_v14 = vshrl.u32 (!%p272_p2), %v432_v3, 7 }
   0x8   : > { %2386 = vmatprep.subr.bf16.mxu0 (!%p272_p2), %v2385_v4  ;;  %v335_v15 = vld [vmem:[%s2891_s2 + $0x58] sm:$0xff] (!%p272_p2)  ;;  %v2391_v16 = vpack.c.bf16 (!%p272_p2), %v330_v12, %v328_v11  ;;  %v332_v17 = vld [vmem:[%s2891_s2 + $0x40] sm:$0xff] (!%p272_p2)  ;;  %v334_v20 = vld [vmem:[%s2891_s2 + $0x50] sm:$0xff] (!%p272_p2)  ;;  %s2465_s9 = smov (!%p272_p2), 111   ;;  %vm340_vm0 = vcmask (!%p272_p2), 523264   ;;  %s2467_s16 = smov (!%p272_p2), 1  }
   0x9   : > { %2388 = vmatpush1.bf16.msra.mxu0 (!%p272_p2), %v2387_v9  ;;  %v434_v18 = vsub.s32 (!%p272_p2), 0, %v433_v14  ;;  %v2393_v19 = vpack.c.bf16 (!%p272_p2), %v335_v15, %v333_v13  ;;  %v2328_v21 = vld [vmem:[%s2892_s3 + $0x4] sm:$0x3] (!%p272_p2)  ;;  %v425_v22 = vld [vmem:[%s2892_s3] sm:$0x3] (!%p272_p2)  ;;  %v438_v23 = vsub.s32 (!%p272_p2), 1, %v433_v14  ;;  %v2395_v30 = vpack.c.bf16 (!%p272_p2), %v334_v20, %v332_v17 }
   0xa   : > { %2390 = vmatprep.subr.bf16.mxu0 (!%p272_p2), %v2389_v10  ;;  %v337_v24 = vld [vmem:[%s2891_s2 + $0x68] sm:$0xff] (!%p272_p2)  ;;  %v339_v25 = vld [vmem:[%s2891_s2 + $0x78] sm:$0xff] (!%p272_p2)  ;;  %v336_v33 = vld [vmem:[%s2891_s2 + $0x60] sm:$0xff] (!%p272_p2)  ;;  %s2468_s17 = smov (!%p272_p2), 15   ;;  %s2469_s18 = smov (!%p272_p2), 16   ;;  %vm444_vm1 = vcmask (!%p272_p2), 908288  }
   0xb   : > { %v2592_v27 = vrot.slane (!%p272_p2), %v2328_v21, %v434_v18  ;;  %v2594_v28 = vrot.slane (!%p272_p2), %v425_v22, %v434_v18  ;;  %v2598_v31 = vrot.slane (!%p272_p2), %v2328_v21, %v438_v23  ;;  %v2397_v32 = vpack.c.bf16 (!%p272_p2), %v339_v25, %v337_v24  ;;  %v338_v34 = vld [vmem:[%s2891_s2 + $0x70] sm:$0xff] (!%p272_p2)  ;;  %s2470_s19 = smov (!%p272_p2), 17   ;;  %s2471_s20 = smov (!%p272_p2), 112   ;;  %v2329_v13 = vld [vmem:[%s2893_s4 + $0x4] sm:$0xf] (!%p272_p2) }
   0xc   : > { %v2608_v35 = vrot.slane (!%p272_p2), %v425_v22, %v438_v23  ;;  %v2399_v36 = vpack.c.bf16 (!%p272_p2), %v338_v34, %v336_v33  ;;  %vm645_vm2 = vcmask (!%p272_p2), 924672   ;;  %vm749_vm3 = vcmask (!%p272_p2), 1039360   ;;  %v1328_v22 = vld [vmem:[%s2894_s5] sm:$0xf] (!%p272_p2) }
   0xd   : > { %s2900_s28 = smov (!%p2535_p3, %s2317_s28), 1  ;;  %2392 = vmatpush1.bf16.msra.mxu0 %v2391_v16  ;;  %641 = vrot.lane.b32.xlu1 %v2592_v27, %s2464_s24  ;;  %vm768_vm4 = vcmask 7168   ;;  %vm664_vm5 = vcmask 121856   ;;  %vm464_vm6 = vcmask 130048   ;;  %vm469_vm7 = vcmask 64512  }
   0xe   : > { %s2383_s10 = sshll.u32 %s2900_s28, 3  ;;  %2394 = vmatprep.subr.bf16.mxu0 %v2393_v19  ;;  %440 = vrot.lane.b32.xlu0 %v2594_v28, %s2465_s9  ;;  %s2322_s11 = sshll.u32 %s2900_s28, 2  ;;  %vm553_vm8 = vcmask 138240   ;;  %v2472_v15 = vmov 0   ;;  %vm1145_vm9 = vcmask 916480   ;;  %vm1374_vm10 = vcmask 1043456  }
   0xf   : > { %s317_s15 = scalar_lea.vmem %s2890_s1, %s2383_s10  ;;  %s312_s14 = scalar_lea.vmem %s2889_s0, %s2322_s11  ;;  %2451 = vset.pattern.permute.xlu0 %v2472_v15  ;;  %vm1370_vm11 = vcmask 31744  }
  0x10   : > { %v419_v26 = vld [vmem:[%s317_s15] sm:$0xff]  ;;  %s2466_s15 = smov 127  }
  0x11   : > { %v421_v29 = vcombine.low %v419_v26, %v419_v26  ;;  %424 = vst [vmem:[#allocation2 + $0x10] sm:$0xf0] %v419_v26  ;;  %2396 = vmatpush1.bf16.msra.mxu0 %v2395_v30  ;;  %643 = vrot.lane.b32.xlu1 %v2598_v31, %s2464_s24  ;;  %v323_v37 = vld [vmem:[%s312_s14] sm:$0xf] }
  0x12   : > { %2398 = vmatprep.subr.bf16.mxu0 %v2397_v32  ;;  %442 = vrot.lane.b32.xlu0 %v2608_v35, %s2465_s9  ;;  %v452_v30 = vld [vmem:[%s2893_s4] sm:$0xf]  ;;  %v1541_v32 = vcombine.low %v2592_v27, %v2598_v31 }
  0x13   : > { %423 = vst [vmem:[#allocation2 + $0x8] sm:$0xf0] %v421_v29 }
  0x15   : > { %2400 = vmatpush1.bf16.msra.mxu0 %v2399_v36  ;;  %747 = vrot.lane.b32.xlu1 %v2608_v35, %s2466_s15 }
  0x16   : > { %745 = vrot.lane.b32.xlu0 %v2594_v28, %s2466_s15 }
  0x18   : > { %2327 = vmatmul.mubr.msk.f32.vlgmr.msra.gmra.mrb[0].mxu0 %vm340_vm0, %v323_v37  ;;  %v1347_v37 = vcombine.low %v2594_v28, %v2608_v35 }
  0x19   : > { %932 = vrot.lane.b32.xlu1 %v2598_v31, %s2467_s16  ;;  %1634 = vmatprep.mubr.f32.mxu0 %v2463_v8 }
  0x1a   : > { %930 = vrot.lane.b32.xlu0 %v2592_v27, %s2467_s16 }
  0x1d   : > { %1034 = vrot.lane.b32.xlu1 %v2608_v35, %s2468_s17 }
  0x1e   : > { %1032 = vrot.lane.b32.xlu0 %v2594_v28, %s2468_s17 }
  0x22   : > { %458 = vrot.lane.b32.xlu0 %v2463_v8, %s2469_s18 }
  0x7f   : > { %v642_v42 = vpop.permute.xlu1 %641 }
  0x80   : > { %v441_v40 = vpop.permute.xlu0 %440  ;;  %v650_v52 = vmul.f32 0.0, %v642_v42 }
  0x81   : > { %v449_v50 = vmul.f32 0.0, %v441_v40 }
  0x83   : > { %v644_v46 = vpop.permute.xlu1 %643 }
  0x84   : > { %v443_v44 = vpop.permute.xlu0 %442  ;;  %v646_v48 = vsel %vm645_vm2, %v642_v42, %v644_v46 }
  0x85   : > { %v445_v45 = vsel %vm444_vm1, %v441_v40, %v443_v44  ;;  %v2332_v40 = vld [vmem:[%s2893_s4 + $0x8] sm:$0xf] }
  0x87   : > { %v748_v53 = vpop.permute.xlu1 %747 }
  0x88   : > { %v746_v54 = vpop.permute.xlu0 %745 }
  0x89   : > { %v750_v56 = vsel %vm749_vm3, %v746_v54, %v748_v53  ;;  %v754_v62 = vmul.f32 0.0, %v746_v54 }
  0x8b   : > { %v933_v57 = vpop.permute.xlu1 %932 }
  0x8c   : > { %v931_v58 = vpop.permute.xlu0 %930  ;;  %v940_v0 = vmul.f32 0.0, %v933_v57 }
  0x8d   : > { %v934_v60 = vsel %vm768_vm4, %v931_v58, %v933_v57 }
  0x8f   : > { %v1035_v1 = vpop.permute.xlu1 %1034 }
  0x90   : > { %v1033_v2 = vpop.permute.xlu0 %1032  ;;  %v1042_v4 = vmul.f32 0.0, %v1035_v1 }
  0x91   : > { %v1036_v5 = vsel %vm664_vm5, %v1033_v2, %v1035_v1 }
  0x94   : > { %v459_v9 = vpop.permute.xlu0 %458 }
  0xeb   : > { %v410_v38 = vpop.f32.mrb[0].mxu0 }
  0xec   : > { %417 = vst [vmem:[#allocation2 + $0x8] sm:$0xf] %v410_v38  ;;  %v412_v39 = vpop.f32.mrb[1].mxu0 }
  0xed   : > { %418 = vst [vmem:[#allocation2 + $0x10] sm:$0xf] %v412_v39 }
  0xf3   : > { %v2633_v41 = vld [vmem:[#allocation2 + $0x8] sm:$0xff] }
  0xf4   : > { %v2635_v43 = vld [vmem:[#allocation2 + $0x10] sm:$0xff]  ;;  %460 = vrot.lane.b32.xlu0 %v2633_v41, %s2469_s18  ;;  %v450_v49 = vmul.f32 %v2633_v41, %v445_v45  ;;  %v651_v51 = vmul.f32 %v2633_v41, %v646_v48  ;;  %v755_v61 = vmul.f32 %v2633_v41, %v750_v56  ;;  %v938_v3 = vmul.f32 %v931_v58, %v2633_v41 }
  0xf5   : > { %462 = vrot.lane.b32.xlu1 %v2635_v43, %s2469_s18  ;;  %v451_v47 = vmul.f32 %v2635_v43, %v443_v44  ;;  %v652_v55 = vmul.f32 %v2635_v43, %v644_v46  ;;  %v756_v59 = vmul.f32 %v2635_v43, %v748_v53  ;;  %v939_v63 = vmul.f32 %v934_v60, %v2635_v43  ;;  %v2334_v46 = vld [vmem:[%s2893_s4 + $0xc] sm:$0xf] }
  0xf6   : > { %v1041_v6 = vmul.f32 %v1036_v5, %v2635_v43  ;;  %v1040_v7 = vmul.f32 %v1033_v2, %v2633_v41  ;;  %v2344_v2 = vld [vmem:[%s2893_s4 + $0x20] sm:$0xf] }
  0xf8   : > { %1228 = vrot.lane.b32.xlu0 %v2598_v31, %s2470_s19 }
  0xf9   : > { %1226 = vrot.lane.b32.xlu1 %v2592_v27, %s2470_s19 }
  0xfc   : > { %551 = vrot.lane.b32.xlu0 %v451_v47, %s2470_s19 }
  0xfd   : > { %549 = vrot.lane.b32.xlu1 %v450_v49, %s2470_s19 }
 0x100   : > { %660 = vrot.lane.b32.xlu0 %v651_v51, %s2468_s17 }
 0x101   : > { %547 = vrot.lane.b32.xlu1 %v449_v50, %s2470_s19 }
 0x104   : > { %658 = vrot.lane.b32.xlu0 %v650_v52, %s2468_s17 }
 0x105   : > { %662 = vrot.lane.b32.xlu1 %v652_v55, %s2468_s17 }
 0x108   : > { %766 = vrot.lane.b32.xlu0 %v756_v59, %s2467_s16  ;;  %v2340_v59 = vld [vmem:[%s2893_s4 + $0x18] sm:$0xf] }
 0x109   : > { %764 = vrot.lane.b32.xlu1 %v755_v61, %s2467_s16  ;;  %v2342_v61 = vld [vmem:[%s2893_s4 + $0x1c] sm:$0xf] }
 0x10c   : > { %948 = vrot.lane.b32.xlu0 %v939_v63, %s2466_s15 }
 0x10d   : > { %762 = vrot.lane.b32.xlu1 %v754_v62, %s2467_s16 }
 0x110   : > { %946 = vrot.lane.b32.xlu0 %v938_v3, %s2466_s15 }
 0x111   : > { %950 = vrot.lane.b32.xlu1 %v940_v0, %s2466_s15 }
 0x114   : > { %1052 = vrot.lane.b32.xlu0 %v1042_v4, %s2464_s24 }
 0x115   : > { %1050 = vrot.lane.b32.xlu1 %v1041_v6, %s2464_s24 }
 0x118   : > { %1141 = vrot.lane.b32.xlu0 %v2635_v43, %s2471_s20 }
 0x119   : > { %1048 = vrot.lane.b32.xlu1 %v1040_v7, %s2464_s24 }
 0x11c   : > { %1139 = vrot.lane.b32.xlu0 %v2633_v41, %s2471_s20 }
 0x11d   : > { %1143 = vrot.lane.b32.xlu1 %v2463_v8, %s2471_s20 }
 0x166   : > { %v461_v10 = vpop.permute.xlu0 %460 }
 0x167   : > { %v463_v11 = vpop.permute.xlu1 %462  ;;  %v465_v14 = vsel %vm464_vm6, %v459_v9, %v461_v10 }
 0x168   : > { %v466_v12 = vsel %vm464_vm6, %v461_v10, %v463_v11 }
 0x169   : > { %473 = vmatprep.subr.mxu1 %v466_v12 }
 0x16a   : > { %v1229_v16 = vpop.permute.xlu0 %1228  ;;  %474 = vmatpush1.msra.mxu1 %v465_v14 }
 0x16b   : > { %v1236_v17 = vmul.f32 0.0, %v1229_v16  ;;  %v1227_v18 = vpop.permute.xlu1 %1226  ;;  %2330 = vmatmul.mubr.msk.f32.vlgmr.msra.gmra.mrb[0].mxu1 %vm469_vm7, %v2329_v13 }
 0x16c   : > { %v1230_v19 = vsel %vm553_vm8, %v1227_v18, %v1229_v16  ;;  %625 = vmatprep.mubr.f32.mxu1 %v2463_v8  ;;  %v1234_v25 = vmul.f32 %v1227_v18, %v2633_v41 }
 0x16d   : > { %v1235_v20 = vmul.f32 %v1230_v19, %v2635_v43  ;;  %1246 = vrot.lane.b32.xlu0 %v1236_v17, %s2465_s9 }
 0x16e   : > { %v552_v21 = vpop.permute.xlu0 %551 }
 0x16f   : > { %v550_v23 = vpop.permute.xlu1 %549  ;;  %1244 = vrot.lane.b32.xlu1 %v1235_v20, %s2465_s9 }
 0x170   : > { %v555_v24 = vsel %vm553_vm8, %v550_v23, %v552_v21 }
 0x171   : > { %561 = vmatprep.subr.mxu1 %v555_v24  ;;  %1331 = vperm.xlu0 %2451, %v1328_v22  }
 0x172   : > { %v661_v26 = vpop.permute.xlu0 %660 }
 0x173   : > { %v548_v29 = vpop.permute.xlu1 %547  ;;  %1242 = vrot.lane.b32.xlu1 %v1234_v25, %s2465_s9 }
 0x174   : > { %v554_v33 = vsel %vm553_vm8, %v548_v29, %v550_v23  ;;  %v1832_v29 = vld [vmem:[#allocation3 + $0xc] sm:$0xf] }
 0x175   : > { %562 = vmatpush1.msra.mxu1 %v554_v33  ;;  %1833 = vrot.lane.b32.xlu0 %v1541_v32, %s2467_s16 }
 0x176   : > { %2331 = vmatmul.mubr.msk.f32.vlgmr.msra.gmra.mrb[0].mxu1 %vm469_vm7, %v452_v30  ;;  %v659_v34 = vpop.permute.xlu0 %658 }
 0x177   : > { %v663_v36 = vpop.permute.xlu1 %662  ;;  %736 = vmatprep.mubr.f32.mxu1 %v2463_v8  ;;  %1542 = vrot.lane.b32.xlu1 %v1541_v32, %s2464_s24  ;;  %v665_v27 = vsel %vm664_vm5, %v659_v34, %v661_v26 }
 0x178   : > { %v666_v38 = vsel %vm664_vm5, %v661_v26, %v663_v36 }
 0x179   : > { %672 = vmatprep.subr.mxu1 %v666_v38  ;;  %1348 = vrot.lane.b32.xlu0 %v1347_v37, %s2465_s9 }
 0x17a   : > { %673 = vmatpush1.msra.mxu1 %v665_v27  ;;  %v767_v31 = vpop.permute.xlu0 %766 }
 0x17b   : > { %v765_v39 = vpop.permute.xlu1 %764  ;;  %1645 = vrot.lane.b32.xlu1 %v1347_v37, %s2466_s15 }
 0x17c   : > { %v770_v42 = vsel %vm768_vm4, %v765_v39, %v767_v31 }
 0x17d   : > { %776 = vmatprep.subr.mxu1 %v770_v42 }
 0x17e   : > { %2333 = vmatmul.mubr.msk.f32.vlgmr.msra.gmra.mrb[0].mxu1 %vm469_vm7, %v2332_v40  ;;  %v949_v35 = vpop.permute.xlu0 %948  ;;  %v1935_v40 = vld [vmem:[#allocation3 + $0xc] sm:$0xf] }
 0x17f   : > { %v763_v28 = vpop.permute.xlu1 %762  ;;  %840 = vmatprep.mubr.f32.mxu1 %v2463_v8  ;;  %1936 = vrot.lane.b32.xlu1 %v1347_v37, %s2468_s17 }
 0x180   : > { %v769_v44 = vsel %vm768_vm4, %v763_v28, %v765_v39 }
 0x181   : > { %777 = vmatpush1.msra.mxu1 %v769_v44 }
 0x182   : > { %854 = vmatprep.subr.mxu1 %v2635_v43  ;;  %v947_v47 = vpop.permute.xlu0 %946  ;;  %v2336_v43 = vld [vmem:[%s2893_s4 + $0x10] sm:$0xf] }
 0x183   : > { %v951_v45 = vpop.permute.xlu1 %950  ;;  %2134 = vrot.lane.b32.xlu1 %v1541_v32, %s2470_s19  ;;  %v952_v51 = vsel %vm749_vm3, %v947_v47, %v949_v35  ;;  %v2038_v47 = vld [vmem:[#allocation3 + $0xc] sm:$0xf] }
 0x184   : > { %v953_v48 = vsel %vm749_vm3, %v949_v35, %v951_v45 }
 0x186   : > { %2335 = vmatmul.mubr.msk.f32.vlgmr.msra.gmra.mrb[0].mxu1 %vm469_vm7, %v2334_v46  ;;  %v1053_v50 = vpop.permute.xlu0 %1052 }
 0x187   : > { %855 = vmatpush1.msra.mxu1 %v2633_v41  ;;  %918 = vmatprep.mubr.f32.mxu1 %v2463_v8  ;;  %v1051_v49 = vpop.permute.xlu1 %1050  ;;  %v2338_v41 = vld [vmem:[%s2893_s4 + $0x14] sm:$0xf] }
 0x188   : > { %959 = vmatprep.subr.mxu1 %v953_v48  ;;  %v1055_v53 = vsel %vm645_vm2, %v1051_v49, %v1053_v50 }
 0x18a   : > { %v1142_v55 = vpop.permute.xlu0 %1141 }
 0x18b   : > { %v1049_v52 = vpop.permute.xlu1 %1048 }
 0x18c   : > { %v1054_v56 = vsel %vm645_vm2, %v1049_v52, %v1051_v49  ;;  %v2133_v52 = vld [vmem:[#allocation3 + $0xc] sm:$0xf] }
 0x18e   : > { %2337 = vmatmul.mubr.msk.f32.vlgmr.msra.gmra.mrb[0].mxu1 %vm469_vm7, %v2336_v43  ;;  %v1140_v58 = vpop.permute.xlu0 %1139 }
 0x18f   : > { %960 = vmatpush1.msra.mxu1 %v952_v51  ;;  %1023 = vmatprep.mubr.f32.mxu1 %v2463_v8  ;;  %v1144_v54 = vpop.permute.xlu1 %1143  ;;  %v1146_v60 = vsel %vm1145_vm9, %v1140_v58, %v1142_v55 }
 0x190   : > { %1061 = vmatprep.subr.mxu1 %v1055_v53  ;;  %v1147_v57 = vsel %vm1145_vm9, %v1142_v55, %v1144_v54 }
 0x196   : > { %2339 = vmatmul.mubr.msk.f32.vlgmr.msra.gmra.mrb[0].mxu1 %vm469_vm7, %v2338_v41 }
 0x197   : > { %1062 = vmatpush1.msra.mxu1 %v1054_v56  ;;  %1125 = vmatprep.mubr.f32.mxu1 %v2463_v8 }
 0x198   : > { %1153 = vmatprep.subr.mxu1 %v1147_v57 }
 0x19e   : > { %2341 = vmatmul.mubr.msk.f32.vlgmr.msra.gmra.mrb[0].mxu1 %vm469_vm7, %v2340_v59  ;;  %v2235_v59 = vld [vmem:[%s2896_s7] sm:$0xf] }
 0x19f   : > { %1154 = vmatpush1.msra.mxu1 %v1146_v60  ;;  %1217 = vmatprep.mubr.f32.mxu1 %v2463_v8 }
 0x1a6   : > { %2343 = vmatmul.mubr.msk.f32.vlgmr.msra.gmra.mrb[0].mxu1 %vm469_vm7, %v2342_v61 }
 0x1a7   : > { %1319 = vmatprep.mubr.f32.mxu1 %v2463_v8 }
 0x1df   : > { %v1247_v62 = vpop.permute.xlu0 %1246 }
 0x1e1   : > { %v1245_v63 = vpop.permute.xlu1 %1244 }
 0x1e2   : > { %v1249_v0 = vsel %vm444_vm1, %v1245_v63, %v1247_v62 }
 0x1e3   : > { %1255 = vmatprep.subr.mxu1 %v1249_v0 }
 0x1e5   : > { %v1243_v1 = vpop.permute.xlu1 %1242 }
 0x1e6   : > { %v1248_v3 = vsel %vm444_vm1, %v1243_v1, %v1245_v63  ;;  %v2353_v1 = vld [vmem:[%s2895_s6 + $0x8] sm:$0xf] }
 0x1e7   : > { %1256 = vmatpush1.msra.mxu1 %v1248_v3 }
 0x1e8   : > { %2345 = vmatmul.mubr.msk.f32.vlgmr.msra.gmra.mrb[0].mxu1 %vm469_vm7, %v2344_v2 }
 0x1e9   : > { %1443 = vmatprep.mubr.f32.mxu1 %v2463_v8  ;;  %v1543_v9 = vpop.permute.xlu1 %1542 }
 0x1ea   : > { %v1544_v16 = vrot.slane %v1543_v9, 4 }
 0x1ec   : > { %v1545_v20 = vsel %vm645_vm2, %v1544_v16, %v1543_v9 }
 0x1ed   : > { %v1646_v14 = vpop.permute.xlu1 %1645 }
 0x1ee   : > { %v1647_v15 = vrot.slane %v1646_v14, 4 }
 0x1f0   : > { %v1332_v4 = vpop.permute.xlu0 %1331  ;;  %v1648_v17 = vsel %vm749_vm3, %v1647_v15, %v1646_v14 }
 0x1f1   : > { %v1937_v32 = vpop.permute.xlu1 %1936 }
 0x1f2   : > { %v1938_v34 = vrot.slane %v1937_v32, 4 }
 0x1f4   : > { %v1834_v26 = vpop.permute.xlu0 %1833  ;;  %v1939_v27 = vsel %vm664_vm5, %v1938_v34, %v1937_v32  ;;  %v1943_v28 = vmul.f32 %v1938_v34, %v1935_v40  ;;  %v2346_v32 = vld [vmem:[%s2895_s6 + $0x4] sm:$0xf] }
 0x1f5   : > { %v1835_v33 = vrot.slane %v1834_v26, 4  ;;  %v2135_v49 = vpop.permute.xlu1 %2134 }
 0x1f6   : > { %v2136_v50 = vrot.slane %v2135_v49, 4 }
 0x1f7   : > { %v1840_v36 = vmul.f32 %v1835_v33, %v1832_v29  ;;  %v1836_v38 = vsel %vm768_vm4, %v1835_v33, %v1834_v26 }
 0x1f8   : > { %v1349_v45 = vpop.permute.xlu0 %1348  ;;  %v2137_v41 = vsel %vm553_vm8, %v2136_v50, %v2135_v49  ;;  %v2141_v55 = vmul.f32 %v2136_v50, %v2133_v52 }
 0x1f9   : > { %v1350_v48 = vrot.slane %v1349_v45, 4 }
 0x1fb   : > { %v1351_v51 = vsel %vm444_vm1, %v1350_v48, %v1349_v45 }
 0x2bb   : > { %v1321_v5 = vpop.f32.mrb[0].mxu1 }
 0x2bc   : > { %v1334_v6 = vadd.f32 %v1332_v4, %v1321_v5  ;;  %v1323_v7 = vpop.f32.mrb[1].mxu1 }
 0x2bd   : > { %v1335_v10 = vadd.f32 %v1332_v4, %v1323_v7 }
 0x2be   : > { %v1336_v11 = vmax.f32 %v1334_v6, 0.0 }
 0x2bf   : > { %v1337_v12 = vmax.f32 %v1335_v10, 0.0  ;;  %v2357_v10 = vld [vmem:[%s2895_s6 + $0xc] sm:$0xf] }
 0x2c1   : > { %v2763_v13 = vcombine.low %v1336_v11, %v1337_v12  ;;  %v2454_v43 = vcombine.low %v1337_v12, %v1337_v12 }
 0x2c3   : > { %1344 = vst [vmem:[#allocation3 + $0x4] sm:$0xff] %v2763_v13  ;;  %v1839_v31 = vmul.f32 %v1836_v38, %v2763_v13  ;;  %v1942_v39 = vmul.f32 %v1939_v27, %v2763_v13  ;;  %v2140_v56 = vmul.f32 %v2137_v41, %v2763_v13 }
 0x2c5   : > { %v1845_v42 = vcombine.high %v1839_v31, %v1839_v31  ;;  %v1948_v44 = vcombine.high %v1942_v39, %v1942_v39  ;;  %v2146_v58 = vcombine.high %v2140_v56, %v2140_v56 }
 0x2ca   : > { %v1643_v18 = vld [vmem:[#allocation3] sm:$0xff]  ;;  %v1540_v19 = vld [vmem:[#allocation3 + $0x8] sm:$0xf] }
 0x2cb   : > { %v1651_v21 = vmul.f32 %v1648_v17, %v1643_v18  ;;  %v1549_v22 = vmul.f32 %v1544_v16, %v1540_v19  ;;  %v1548_v23 = vmul.f32 %v1643_v18, %v1545_v20  ;;  %v1644_v30 = vld [vmem:[#allocation3 + $0x8] sm:$0xf]  ;;  %v1361_v46 = vcombine.high %v1643_v18, %v1643_v18  ;;  %v2361_v17 = vld [vmem:[%s2895_s6 + $0x10] sm:$0xf] }
 0x2cc   : > { %v1652_v37 = vmul.f32 %v1647_v15, %v1644_v30  ;;  %v1346_v35 = vld [vmem:[#allocation3 + $0x8] sm:$0xf]  ;;  %v1354_v53 = vmul.f32 %v1643_v18, %v1351_v51 }
 0x2cd   : > { %1559 = vrot.lane.b32.xlu1 %v1549_v22, %s2468_s17  ;;  %v1554_v24 = vcombine.high %v1548_v23, %v1548_v23  ;;  %v1657_v25 = vcombine.high %v1651_v21, %v1651_v21  ;;  %v1355_v54 = vmul.f32 %v1350_v48, %v1346_v35 }
 0x2ce   : > { %v1452_v57 = vcombine.high %v1354_v53, %v1354_v53 }
 0x2cf   : > { %1557 = vrot.lane.b32.xlu0 %v1554_v24, %s2468_s17  ;;  %v2365_v24 = vld [vmem:[%s2895_s6 + $0x14] sm:$0xf] }
 0x2d1   : > { %1660 = vrot.lane.b32.xlu1 %v1657_v25, %s2467_s16 }
 0x2d3   : > { %1555 = vrot.lane.b32.xlu0 %v1548_v23, %s2468_s17  ;;  %s322_s17 = scalar_lea.vmem %s2897_s8, %s2383_s10 }
 0x2d5   : > { %1658 = vrot.lane.b32.xlu1 %v1651_v21, %s2467_s16 }
 0x2d7   : > { %1662 = vrot.lane.b32.xlu0 %v1652_v37, %s2467_s16  ;;  %v2369_v37 = vld [vmem:[%s2895_s6 + $0x18] sm:$0xf] }
 0x2d9   : > { %1850 = vrot.lane.b32.xlu1 %v1840_v36, %s2466_s15 }
 0x2db   : > { %1846 = vrot.lane.b32.xlu0 %v1839_v31, %s2466_s15 }
 0x2dd   : > { %1949 = vrot.lane.b32.xlu1 %v1942_v39, %s2464_s24 }
 0x2df   : > { %1848 = vrot.lane.b32.xlu0 %v1845_v42, %s2466_s15 }
 0x2e1   : > { %1366 = vrot.lane.b32.xlu1 %v1346_v35, %s2469_s18  ;;  %v2373_v35 = vld [vmem:[%s2895_s6 + $0x1c] sm:$0xf] }
 0x2e3   : > { %1953 = vrot.lane.b32.xlu0 %v1943_v28, %s2464_s24 }
 0x2e5   : > { %1951 = vrot.lane.b32.xlu1 %v1948_v44, %s2464_s24  ;;  %v1356_v44 = vld [vmem:[%s2895_s6] sm:$0xf] }
 0x2e7   : > { %1364 = vrot.lane.b32.xlu0 %v1361_v46, %s2469_s18 }
 0x2e9   : > { %2048 = vrot.lane.b32.xlu1 %v2038_v47, %s2471_s20  ;;  %v2377_v47 = vld [vmem:[%s2895_s6 + $0x20] sm:$0xf] }
 0x2eb   : > { %2046 = vrot.lane.b32.xlu0 %v2454_v43, %s2471_s20 }
 0x2ed   : > { %2044 = vrot.lane.b32.xlu1 %v2763_v13, %s2471_s20 }
 0x2ef   : > { %1362 = vrot.lane.b32.xlu0 %v1643_v18, %s2469_s18 }
 0x2f1   : > { %1457 = vrot.lane.b32.xlu1 %v1355_v54, %s2470_s19 }
 0x2f3   : > { %1455 = vrot.lane.b32.xlu0 %v1452_v57, %s2470_s19 }
 0x2f5   : > { %2151 = vrot.lane.b32.xlu1 %v2141_v55, %s2465_s9 }
 0x2f7   : > { %2149 = vrot.lane.b32.xlu0 %v2146_v58, %s2465_s9 }
 0x2f9   : > { %2147 = vrot.lane.b32.xlu1 %v2140_v56, %s2465_s9 }
 0x2fb   : > { %1453 = vrot.lane.b32.xlu0 %v1354_v53, %s2470_s19 }
 0x2ff   : > { %2238 = vperm.xlu0 %2451, %v2235_v59  }
 0x33f   : > { %v1560_v60 = vpop.permute.xlu1 %1559 }
 0x341   : > { %v1558_v61 = vpop.permute.xlu0 %1557 }
 0x342   : > { %v1562_v62 = vsel %vm664_vm5, %v1558_v61, %v1560_v60 }
 0x343   : > { %v1661_v63 = vpop.permute.xlu1 %1660  ;;  %2354 = vmatprep.subr.msk.mxu0 %vm1374_vm10, %v1562_v62 }
 0x345   : > { %v1556_v0 = vpop.permute.xlu0 %1555 }
 0x346   : > { %v1561_v2 = vsel %vm664_vm5, %v1556_v0, %v1558_v61 }
 0x347   : > { %v1659_v3 = vpop.permute.xlu1 %1658  ;;  %2355 = vmatpush1.msk.msra.mxu0 %vm1374_vm10, %v1561_v2 }
 0x348   : > { %2356 = vmatmul.mubr.msk.f32.vlgmr.msra.gmra.mrb[2].mxu0 %vm1370_vm11, %v2353_v1  ;;  %v1664_v7 = vsel %vm768_vm4, %v1659_v3, %v1661_v63 }
 0x349   : > { %v1663_v4 = vpop.permute.xlu0 %1662  ;;  %1737 = vmatprep.mubr.f32.mxu0 %v2463_v8 }
 0x34a   : > { %v1665_v5 = vsel %vm768_vm4, %v1661_v63, %v1663_v4 }
 0x34b   : > { %v1851_v6 = vpop.permute.xlu1 %1850  ;;  %2358 = vmatprep.subr.msk.mxu0 %vm1374_vm10, %v1665_v5 }
 0x34c   : > { %2359 = vmatpush1.msk.msra.mxu0 %vm1374_vm10, %v1664_v7 }
 0x34d   : > { %2362 = vmatprep.subr.msk.mxu0 %vm1374_vm10, %v2454_v43  ;;  %v1847_v9 = vpop.permute.xlu0 %1846 }
 0x34f   : > { %v1950_v11 = vpop.permute.xlu1 %1949 }
 0x350   : > { %2360 = vmatmul.mubr.msk.f32.vlgmr.msra.gmra.mrb[2].mxu0 %vm1370_vm11, %v2357_v10 }
 0x351   : > { %2363 = vmatpush1.msk.msra.mxu0 %vm1374_vm10, %v2763_v13  ;;  %v1849_v12 = vpop.permute.xlu0 %1848  ;;  %1822 = vmatprep.mubr.f32.mxu0 %v2463_v8 }
 0x352   : > { %v1853_v14 = vsel %vm749_vm3, %v1849_v12, %v1851_v6  ;;  %v1852_v20 = vsel %vm749_vm3, %v1847_v9, %v1849_v12 }
 0x353   : > { %v1367_v15 = vpop.permute.xlu1 %1366  ;;  %2366 = vmatprep.subr.msk.mxu0 %vm1374_vm10, %v1853_v14 }
 0x355   : > { %v1954_v16 = vpop.permute.xlu0 %1953 }
 0x357   : > { %v1952_v18 = vpop.permute.xlu1 %1951 }
 0x358   : > { %v1956_v19 = vsel %vm645_vm2, %v1952_v18, %v1954_v16  ;;  %2364 = vmatmul.mubr.msk.f32.vlgmr.msra.gmra.mrb[2].mxu0 %vm1370_vm11, %v2361_v17  ;;  %v1955_v26 = vsel %vm645_vm2, %v1950_v11, %v1952_v18 }
 0x359   : > { %2367 = vmatpush1.msk.msra.mxu0 %vm1374_vm10, %v1852_v20  ;;  %v1365_v13 = vpop.permute.xlu0 %1364  ;;  %1925 = vmatprep.mubr.f32.mxu0 %v2463_v8 }
 0x35a   : > { %2370 = vmatprep.subr.msk.mxu0 %vm1374_vm10, %v1956_v19  ;;  %v1369_v21 = vsel %vm464_vm6, %v1365_v13, %v1367_v15 }
 0x35b   : > { %v2049_v22 = vpop.permute.xlu1 %2048  ;;  %2347 = vmatprep.subr.msk.mxu1 %vm1374_vm10, %v1369_v21 }
 0x35d   : > { %v2047_v23 = vpop.permute.xlu0 %2046 }
 0x35e   : > { %v2051_v29 = vsel %vm1145_vm9, %v2047_v23, %v2049_v22 }
 0x35f   : > { %v2045_v25 = vpop.permute.xlu1 %2044 }
 0x360   : > { %2368 = vmatmul.mubr.msk.f32.vlgmr.msra.gmra.mrb[2].mxu0 %vm1370_vm11, %v2365_v24  ;;  %v2050_v31 = vsel %vm1145_vm9, %v2045_v25, %v2047_v23 }
 0x361   : > { %2371 = vmatpush1.msk.msra.mxu0 %vm1374_vm10, %v1955_v26  ;;  %v1363_v30 = vpop.permute.xlu0 %1362  ;;  %2028 = vmatprep.mubr.f32.mxu0 %v2463_v8 }
 0x362   : > { %2374 = vmatprep.subr.msk.mxu0 %vm1374_vm10, %v2051_v29  ;;  %v1368_v33 = vsel %vm464_vm6, %v1363_v30, %v1365_v13 }
 0x363   : > { %v1458_v34 = vpop.permute.xlu1 %1457  ;;  %2348 = vmatpush1.msk.msra.mxu1 %vm1374_vm10, %v1368_v33 }
 0x364   : > { %2349 = vmatmul.mubr.msk.f32.vlgmr.msra.gmra.mrb[2].mxu1 %vm1370_vm11, %v2346_v32 }
 0x365   : > { %v1456_v36 = vpop.permute.xlu0 %1455  ;;  %1532 = vmatprep.mubr.f32.mxu1 %v2463_v8 }
 0x366   : > { %v1460_v38 = vsel %vm553_vm8, %v1456_v36, %v1458_v34 }
 0x367   : > { %v2152_v27 = vpop.permute.xlu1 %2151  ;;  %2350 = vmatprep.subr.msk.mxu1 %vm1374_vm10, %v1460_v38 }
 0x368   : > { %2372 = vmatmul.mubr.msk.f32.vlgmr.msra.gmra.mrb[2].mxu0 %vm1370_vm11, %v2369_v37 }
 0x369   : > { %2375 = vmatpush1.msk.msra.mxu0 %vm1374_vm10, %v2050_v31  ;;  %v2150_v39 = vpop.permute.xlu0 %2149  ;;  %2123 = vmatprep.mubr.f32.mxu0 %v2463_v8 }
 0x36a   : > { %v2154_v40 = vsel %vm444_vm1, %v2150_v39, %v2152_v27 }
 0x36b   : > { %2378 = vmatprep.subr.msk.mxu0 %vm1374_vm10, %v2154_v40  ;;  %v2148_v42 = vpop.permute.xlu1 %2147 }
 0x36c   : > { %v2153_v46 = vsel %vm444_vm1, %v2148_v42, %v2150_v39 }
 0x36d   : > { %v1454_v28 = vpop.permute.xlu0 %1453 }
 0x36e   : > { %v1459_v45 = vsel %vm553_vm8, %v1454_v28, %v1456_v36 }
 0x36f   : > { %2351 = vmatpush1.msk.msra.mxu1 %vm1374_vm10, %v1459_v45 }
 0x370   : > { %2376 = vmatmul.mubr.msk.f32.vlgmr.msra.gmra.mrb[2].mxu0 %vm1370_vm11, %v2373_v35  ;;  %2352 = vmatmul.mubr.msk.f32.vlgmr.msra.gmra.mrb[2].mxu1 %vm1370_vm11, %v1356_v44 }
 0x371   : > { %2379 = vmatpush1.msk.msra.mxu0 %vm1374_vm10, %v2153_v46  ;;  %2226 = vmatprep.mubr.f32.mxu0 %v2463_v8 }
 0x378   : > { %2380 = vmatmul.mubr.msk.f32.vlgmr.msra.gmra.mrb[2].mxu0 %vm1370_vm11, %v2377_v47 }
 0x37e   : > { %v2239_v52 = vpop.permute.xlu0 %2238 }
 0x443   : > { %v1534_v48 = vpop.f32.mrb[2].mxu1 }
 0x444   : > { %v1536_v49 = vpop.f32.mrb[3].mxu1 }
 0x44b   : > { %v2228_v43 = vpop.f32.mrb[2].mxu0 }
 0x44c   : > { %v2401_v50 = vadd.f32 %v2228_v43, %v1534_v48  ;;  %v2230_v51 = vpop.f32.mrb[3].mxu0 }
 0x44d   : > { %v2402_v53 = vadd.f32 %v2230_v51, %v1536_v49 }
 0x44e   : > { %v2241_v41 = vadd.f32 %v2401_v50, %v2239_v52 }
 0x44f   : > { %v2242_v54 = vadd.f32 %v2402_v53, %v2239_v52 }
 0x450   : > { %v2243_v55 = vmax.f32 %v2241_v41, 0.0 }
 0x451   : > { %v2244_v56 = vmax.f32 %v2242_v54, 0.0 }
 0x453   : > { %v2247_v8 = vcombine.low %v2243_v55, %v2244_v56 }
 0x455   : > { %2249 = vst [vmem:[%s322_s17] sm:$0xff] %v2247_v8 }
 0x456 PF: > { %s18_s27 = sadd.s32 1, %s2461_s27  }
 0x457   : > { %p15_p4 = scmp.ge.s32.totalorder %s18_s27, 4  }
 0x459   :  { %17 = sbr.rel (!%p15_p4) target bundleno = 1 (0x1), region = 102 }

</bundles_post_ra>
